<compile_context>
chip_gen: v6e
topology: v6e:2x2x1
jax: 0.10.0
libtpu: 0.0.40
codegen_flags: <defaults>
</compile_context>

<pallas_src>
import functools

import jax
import jax.numpy as jnp
from jax.experimental import pallas as pl
from jax.experimental.pallas import tpu as pltpu

N_EMBD = 128
HIDDEN = 4 * N_EMBD  # 512
DROPOUT = 0.0        # p=0.0 -> identity; nothing to do in the kernel.


def _round_up(x, m):
    return ((x + m - 1) // m) * m


def _ffwd_kernel(x_ref, w1_ref, b1_ref, w2_ref, b2_ref, o_ref):
    # x_ref:  (TM, N_EMBD)      original dtype (cast to bf16 in-kernel)
    # w1_ref: (N_EMBD, HIDDEN)  bf16 ; b1_ref: (1, HIDDEN) f32
    # w2_ref: (HIDDEN, N_EMBD)  bf16 ; b2_ref: (1, N_EMBD) f32
    # In-kernel cast: free VPU op, halves x's HBM traffic vs. a wrapper cast.
    x = x_ref[...].astype(jnp.bfloat16)
    # First matmul on the MXU: bf16 operands, f32 accumulation.
    h = jnp.dot(x, w1_ref[...], preferred_element_type=jnp.float32)
    # Epilogue in f32 (bias + ReLU) — VPU filler under the MXU / DMA.
    h = jnp.maximum(h + b1_ref[...], 0.0)
    # Second matmul: cast activations back to bf16 for the MXU.
    out = jnp.dot(h.astype(w2_ref.dtype), w2_ref[...],
                  preferred_element_type=jnp.float32)
    out = out + b2_ref[...]
    # Dropout(p=0.0) is the identity.
    o_ref[...] = out.astype(o_ref.dtype)


@functools.partial(jax.jit, static_argnames=("tm",))
def feed_forward(x, w1, b1, w2, b2, *, tm=512):
    """x: (..., N_EMBD) -> (..., N_EMBD). Matches nn.Linear->ReLU->nn.Linear."""
    orig_shape = x.shape
    orig_dtype = x.dtype
    x2 = x.reshape(-1, N_EMBD)
    m = x2.shape[0]

    # Large row tile (default 512) to amortize per-step pipeline overhead;
    # shrink only if the whole problem is smaller than one tile. Always a
    # multiple of 8 sublanes. Ragged last block is handled by Pallas (row-wise
    # kernel, so padded garbage rows only produce discarded output rows).
    tm_eff = max(8, min(tm, _round_up(m, 8)))
    grid_m = pl.cdiv(m, tm_eff)

    # Weights as bf16 MXU operands; biases f32 for the f32 epilogue.
    # (No cast of x here — done inside the kernel to avoid an extra HBM pass.)
    w1b = w1.astype(jnp.bfloat16)
    w2b = w2.astype(jnp.bfloat16)
    b1f = b1.reshape(1, HIDDEN).astype(jnp.float32)
    b2f = b2.reshape(1, N_EMBD).astype(jnp.float32)

    out = pl.pallas_call(
        _ffwd_kernel,
        out_shape=jax.ShapeDtypeStruct((m, N_EMBD), orig_dtype),
        grid_spec=pltpu.PrefetchScalarGridSpec(
            num_scalar_prefetch=0,
            grid=(grid_m,),
            in_specs=[
                pl.BlockSpec((tm_eff, N_EMBD), lambda i: (i, 0)),  # x rows
                # Constant index_map => weights/biases are DMA'd once and stay
                # resident in VMEM across all row tiles.
                pl.BlockSpec((N_EMBD, HIDDEN), lambda i: (0, 0)),  # W1
                pl.BlockSpec((1, HIDDEN), lambda i: (0, 0)),       # b1
                pl.BlockSpec((HIDDEN, N_EMBD), lambda i: (0, 0)),  # W2
                pl.BlockSpec((1, N_EMBD), lambda i: (0, 0)),       # b2
            ],
            out_specs=pl.BlockSpec((tm_eff, N_EMBD), lambda i: (i, 0)),
        ),
        compiler_params=pltpu.CompilerParams(
            # Row-tile axis is embarrassingly parallel -> sharded across
            # TensorCores on v7x; harmless on single-TC v5e/v6e.
            dimension_semantics=("parallel",)),
    )(x2, w1b, b1f, w2b, b2f)

    return out.reshape(orig_shape)


def init_params(key):
    """Deterministic PyTorch-style (Kaiming-uniform) Linear init.

    Weights stored as (in, out) in bf16 (MXU-native); biases in f32.
    """
    k1, k2, k3, k4 = jax.random.split(key, 4)
    bound1 = 1.0 / jnp.sqrt(N_EMBD)
    bound2 = 1.0 / jnp.sqrt(HIDDEN)
    w1 = jax.random.uniform(k1, (N_EMBD, HIDDEN), jnp.float32,
                            -bound1, bound1).astype(jnp.bfloat16)
    b1 = jax.random.uniform(k2, (1, HIDDEN), jnp.float32, -bound1, bound1)
    w2 = jax.random.uniform(k3, (HIDDEN, N_EMBD), jnp.float32,
                            -bound2, bound2).astype(jnp.bfloat16)
    b2 = jax.random.uniform(k4, (1, N_EMBD), jnp.float32, -bound2, bound2)
    return w1, b1, w2, b2


if __name__ == "__main__":
    key = jax.random.PRNGKey(0)
    kx, kp = jax.random.split(key)

    batch, seq = 2, 8
    x = jax.random.normal(kx, (batch, seq, N_EMBD), jnp.float32)
    w1, b1, w2, b2 = init_params(kp)

    out = feed_forward(x, w1, b1, w2, b2)
    out = jax.block_until_ready(out)

    # Pure-JAX reference with the same bf16-operand / f32-accumulate math.
    # NOTE: bf16 operands lose a little precision vs. a pure-f32 PyTorch
    # FeedForward; the 2e-2 tolerance absorbs it.
    x2 = x.reshape(-1, N_EMBD).astype(jnp.bfloat16)
    h_ref = jnp.maximum(
        jnp.dot(x2, w1, preferred_element_type=jnp.float32) + b1[0], 0.0)
    ref = (jnp.dot(h_ref.astype(jnp.bfloat16), w2,
                   preferred_element_type=jnp.float32) + b2[0])
    ref = ref.reshape(x.shape).astype(x.dtype)

    assert out.shape == x.shape
    assert out.dtype == x.dtype
    assert jnp.allclose(out, ref, atol=2e-2, rtol=2e-2)

    print("KERNEL_OK")
</pallas_src>

<mosaic_0001>
module attributes {stable_mosaic.version = 11 : i64} {
  func.func @_ffwd_kernel(%arg0: i32, %arg1: memref<16x128xf32, #tpu.memory_space<vmem>>, %arg2: memref<128x512xbf16, #tpu.memory_space<vmem>>, %arg3: memref<1x512xf32, #tpu.memory_space<vmem>>, %arg4: memref<512x128xbf16, #tpu.memory_space<vmem>>, %arg5: memref<1x128xf32, #tpu.memory_space<vmem>>, %arg6: memref<16x128xf32, #tpu.memory_space<vmem>>) attributes {dimension_semantics = [#tpu.dimension_semantics<parallel>], iteration_bounds = array<i64: 1>, scalar_prefetch = 0 : i64, scratch_operands = 0 : i64, tpu.core_type = #tpu.core_type<tc>, window_params = [{transform_indices = @transform_0, window_bounds = array<i64: 16, 128>}, {pipeline_mode = #tpu.pipeline_mode<synchronous>, transform_indices = @transform_1, window_bounds = array<i64: 128, 512>}, {pipeline_mode = #tpu.pipeline_mode<synchronous>, transform_indices = @transform_2, window_bounds = array<i64: 1, 512>}, {pipeline_mode = #tpu.pipeline_mode<synchronous>, transform_indices = @transform_3, window_bounds = array<i64: 512, 128>}, {pipeline_mode = #tpu.pipeline_mode<synchronous>, transform_indices = @transform_4, window_bounds = array<i64: 1, 128>}, {transform_indices = @transform_5, window_bounds = array<i64: 16, 128>}]} {
    %c0 = arith.constant 0 : index
    %c0_0 = arith.constant 0 : index
    %0 = vector.load %arg1[%c0, %c0_0] : memref<16x128xf32, #tpu.memory_space<vmem>>, vector<16x128xf32>
    %1 = arith.truncf %0 : vector<16x128xf32> to vector<16x128xbf16>
    %c0_1 = arith.constant 0 : index
    %c0_2 = arith.constant 0 : index
    %2 = vector.load %arg2[%c0_1, %c0_2] : memref<128x512xbf16, #tpu.memory_space<vmem>>, vector<128x512xbf16>
    %cst = arith.constant dense<0.000000e+00> : vector<16x512xf32>
    %3 = tpu.matmul %1, %2, %cst {dimension_numbers = #tpu.dot_dimension_numbers<[1], [0], [0], [1], [0, 0, 1, 1], [], []>} : vector<16x128xbf16>, vector<128x512xbf16>, vector<16x512xf32> -> vector<16x512xf32>
    %c0_3 = arith.constant 0 : index
    %c0_4 = arith.constant 0 : index
    %4 = vector.load %arg3[%c0_3, %c0_4] : memref<1x512xf32, #tpu.memory_space<vmem>>, vector<1x512xf32>
    %5 = vector.broadcast %4 : vector<1x512xf32> to vector<16x512xf32>
    %6 = arith.addf %3, %5 : vector<16x512xf32>
    %cst_5 = arith.constant 0.000000e+00 : f32
    %7 = vector.broadcast %cst_5 : f32 to vector<16x512xf32>
    %8 = arith.maximumf %6, %7 : vector<16x512xf32>
    %9 = arith.truncf %8 : vector<16x512xf32> to vector<16x512xbf16>
    %c0_6 = arith.constant 0 : index
    %c0_7 = arith.constant 0 : index
    %10 = vector.load %arg4[%c0_6, %c0_7] : memref<512x128xbf16, #tpu.memory_space<vmem>>, vector<512x128xbf16>
    %cst_8 = arith.constant dense<0.000000e+00> : vector<16x128xf32>
    %11 = tpu.matmul %9, %10, %cst_8 {dimension_numbers = #tpu.dot_dimension_numbers<[1], [0], [0], [1], [0, 0, 1, 1], [], []>} : vector<16x512xbf16>, vector<512x128xbf16>, vector<16x128xf32> -> vector<16x128xf32>
    %c0_9 = arith.constant 0 : index
    %c0_10 = arith.constant 0 : index
    %12 = vector.load %arg5[%c0_9, %c0_10] : memref<1x128xf32, #tpu.memory_space<vmem>>, vector<1x128xf32>
    %13 = vector.broadcast %12 : vector<1x128xf32> to vector<16x128xf32>
    %14 = arith.addf %11, %13 : vector<16x128xf32>
    %c0_11 = arith.constant 0 : index
    %c0_12 = arith.constant 0 : index
    %15 = vector.load %arg6[%c0_11, %c0_12] : memref<16x128xf32, #tpu.memory_space<vmem>>, vector<16x128xf32>
    tpu.vector_store %arg6[%c0_11, %c0_12], %14 {strides = array<i32>} : memref<16x128xf32, #tpu.memory_space<vmem>>, vector<16x128xf32>,
    return
  }
  func.func @transform_0(%arg0: i32) -> (i32, i32) {
    %c0_i32 = arith.constant 0 : i32
    %c0_i32_0 = arith.constant 0 : i32
    return %arg0, %c0_i32 : i32, i32
  }
  func.func @transform_1(%arg0: i32) -> (i32, i32) {
    %c0_i32 = arith.constant 0 : i32
    %c0_i32_0 = arith.constant 0 : i32
    %c0_i32_1 = arith.constant 0 : i32
    return %c0_i32, %c0_i32_0 : i32, i32
  }
  func.func @transform_2(%arg0: i32) -> (i32, i32) {
    %c0_i32 = arith.constant 0 : i32
    %c0_i32_0 = arith.constant 0 : i32
    %c0_i32_1 = arith.constant 0 : i32
    return %c0_i32, %c0_i32_0 : i32, i32
  }
  func.func @transform_3(%arg0: i32) -> (i32, i32) {
    %c0_i32 = arith.constant 0 : i32
    %c0_i32_0 = arith.constant 0 : i32
    %c0_i32_1 = arith.constant 0 : i32
    return %c0_i32, %c0_i32_0 : i32, i32
  }
  func.func @transform_4(%arg0: i32) -> (i32, i32) {
    %c0_i32 = arith.constant 0 : i32
    %c0_i32_0 = arith.constant 0 : i32
    %c0_i32_1 = arith.constant 0 : i32
    return %c0_i32, %c0_i32_0 : i32, i32
  }
  func.func @transform_5(%arg0: i32) -> (i32, i32) {
    %c0_i32 = arith.constant 0 : i32
    %c0_i32_0 = arith.constant 0 : i32
    return %arg0, %c0_i32 : i32, i32
  }
}

</mosaic_0001>

<bundles_post_ra>
// kernel: feed_forward.1
= control target key start
LH: loop header
LB: loop body
LE: loop exit
PB: predicated region body
PF: predicated region fallthrough
CT: control target
= control target key end

     0   :  { %10 = vsyncpa [#allocation3], 0  ;;  %s1094_s0 = inlined_call_operand.hbm [shape: f32[16,128], index: 0, kind: input, shape index: {}]   ;;  %s1095_s1 = inlined_call_operand.hbm [shape: bf16[128,512], index: 1, kind: input, shape index: {}]   ;;  %s1096_s2 = inlined_call_operand.vmem [shape: f32[1,512], index: 2, kind: input, shape index: {}]   ;;  %s1097_s3 = inlined_call_operand.hbm [shape: bf16[512,128], index: 3, kind: input, shape index: {}]   ;;  %s1098_s4 = inlined_call_operand.vmem [shape: f32[1,128], index: 4, kind: input, shape index: {}]   ;;  %s1099_s5 = inlined_call_operand.hbm [shape: f32[16,128], index: 5, kind: output, shape index: {}]  }
   0x1   :  { %11 = vsyncpa [#allocation6], 0 }
   0x2   :  { %12 = vsyncpa [#allocation4], 0  ;;  %s1029_s18 = smov [#allocation5]  }
   0x3   :  { %s30_s19 = sshll.u32 %s1029_s18, 4  ;;  %s31_s19 = int_to_ptr.vmem [resolvable:$true] %s30_s19 }
   0x4   :  { %s951_s20 = scalar_lea.vmem %s31_s19, 4096  ;;  %p956_p1 = scmp.lt.s32.totalorder %s31_s19, %s31_s19 }
   0x5   :  { %p952_p0 = scmp.ne.s32.totalorder %s31_s19, %s951_s20  ;;  %p957_p2 = scmp.lt.s32.totalorder %s951_s20, %s951_s20 }
   0x7   :  { %p958_p3 = por %p957_p2, %p956_p1 }
   0x9   :  { %p959_p4 = pnand %p958_p3, %p952_p0 }
   0xb   :  { %962 = shalt.err (!%p959_p4)
}
   0xc   :  { %s1030_s21 = smov 256   ;;  %s1031_s22 = smov 16  }
   0xd   :  { %36 = dma.hbm_to_vmem [thread:$0]  %s1095_s1, 4096, %s31_s19, [#allocation6], %s1030_s21, %s1030_s21, %s1031_s22  }
   0xe   :  { %s1032_s25 = smov [#allocation2]  }
   0xf   :  { %s18_s26 = sshll.u32 %s1032_s25, 4  ;;  %s19_s26 = int_to_ptr.vmem [resolvable:$true] %s18_s26 }
  0x10   :  { %s971_s27 = scalar_lea.vmem %s19_s26, 256  ;;  %p976_p6 = scmp.lt.s32.totalorder %s19_s26, %s19_s26 }
  0x11   :  { %p972_p5 = scmp.ne.s32.totalorder %s19_s26, %s971_s27  ;;  %p977_p7 = scmp.lt.s32.totalorder %s971_s27, %s971_s27 }
  0x13   :  { %p978_p8 = por %p977_p7, %p976_p6 }
  0x15   :  { %p979_p9 = pnand %p978_p8, %p972_p5 }
  0x17   :  { %982 = shalt.err (!%p979_p9)
}
  0x18   :  { %s1033_s28 = smov 128   ;;  %s1034_s29 = smov 8  }
  0x19   :  { %24 = dma.hbm_to_vmem [thread:$0]  %s1094_s0, 256, %s19_s26, [#allocation3], %s1033_s28, %s1033_s28, %s1034_s29  }
  0x1a   :  { %s1035_s1 = smov [#allocation7]  }
  0x1b   :  { %s44_s7 = sshll.u32 %s1035_s1, 4  ;;  %s45_s7 = int_to_ptr.vmem [resolvable:$true] %s44_s7 }
  0x1c   :  { %s991_s8 = scalar_lea.vmem %s45_s7, 4096  ;;  %p996_p11 = scmp.lt.s32.totalorder %s45_s7, %s45_s7 }
  0x1d   :  { %p992_p10 = scmp.ne.s32.totalorder %s45_s7, %s991_s8  ;;  %p997_p12 = scmp.lt.s32.totalorder %s991_s8, %s991_s8 }
  0x1f   :  { %p998_p13 = por %p997_p12, %p996_p11 }
  0x21   :  { %p999_p0 = pnand %p998_p13, %p992_p10 }
  0x23   :  { %1002 = shalt.err (!%p999_p0)
}
  0x24   :  { %s1036_s9 = smov 64   ;;  %s1037_s10 = smov 4  }
  0x25   :  { %50 = dma.hbm_to_vmem [thread:$0]  %s1097_s3, 4096, %s45_s7, [#allocation6], %s1036_s9, %s1036_s9, %s1037_s10  }
  0x26   :  { %1023 = dma.done.wait [#allocation3], 256  }
  0x27   :  { %1024 = vsyncadd [#allocation3], 4294967040 }
  0x28   :  { %1025 = dma.done.wait [#allocation6], 8192  }
  0x29   :  { %1026 = vsyncadd [#allocation6], 4294959104  ;;  %v1038_v0 = vmov 0   ;;  %v863_v1 = vld [vmem:[#allocation5 + $0xe4] ss:$16 sps:$4 sm:$0xff]   ;;  %v64_v34 = vld [vmem:[#allocation2 + $0x8] sm:$0xff] }
  0x2a   :  { %312 = vmatprep.mubr.bf16.mxu0 %v1038_v0  ;;  %355 = vmatprep.mubr.bf16.mxu1 %v1038_v0  ;;  %v865_v2 = vld [vmem:[#allocation5 + $0xec] ss:$16 sps:$4 sm:$0xff]   ;;  %v867_v3 = vld [vmem:[#allocation5 + $0xe0] ss:$16 sps:$4 sm:$0xff]   ;;  %v868_v4 = vld [vmem:[#allocation5 + $0xe8] ss:$16 sps:$4 sm:$0xff]  }
  0x2b   :  { %280 = vmatprep.subr.bf16.mxu0 %v863_v1  ;;  %323 = vmatprep.subr.bf16.mxu1 %v865_v2  ;;  %v869_v5 = vld [vmem:[#allocation5 + $0xc4] ss:$16 sps:$4 sm:$0xff]   ;;  %v871_v6 = vld [vmem:[#allocation5 + $0xcc] ss:$16 sps:$4 sm:$0xff]   ;;  %v873_v7 = vld [vmem:[#allocation5 + $0xc0] ss:$16 sps:$4 sm:$0xff]  }
  0x2c   :  { %281 = vmatpush1.bf16.msra.mxu0 %v867_v3  ;;  %324 = vmatpush1.bf16.msra.mxu1 %v868_v4  ;;  %v874_v8 = vld [vmem:[#allocation5 + $0xc8] ss:$16 sps:$4 sm:$0xff]   ;;  %v875_v9 = vld [vmem:[#allocation5 + $0xa4] ss:$16 sps:$4 sm:$0xff]   ;;  %v877_v10 = vld [vmem:[#allocation5 + $0xac] ss:$16 sps:$4 sm:$0xff]   ;;  %v100_v4 = vlaneseq }
  0x2d   :  { %282 = vmatprep.subr.bf16.mxu0 %v869_v5  ;;  %325 = vmatprep.subr.bf16.mxu1 %v871_v6  ;;  %v879_v11 = vld [vmem:[#allocation5 + $0xa0] ss:$16 sps:$4 sm:$0xff]   ;;  %v880_v12 = vld [vmem:[#allocation5 + $0xa8] ss:$16 sps:$4 sm:$0xff]   ;;  %v881_v13 = vld [vmem:[#allocation5 + $0x84] ss:$16 sps:$4 sm:$0xff]  }
  0x2e   :  { %v883_v14 = vld [vmem:[#allocation5 + $0x8c] ss:$16 sps:$4 sm:$0xff]   ;;  %v885_v15 = vld [vmem:[#allocation5 + $0x80] ss:$16 sps:$4 sm:$0xff]   ;;  %v886_v16 = vld [vmem:[#allocation5 + $0x88] ss:$16 sps:$4 sm:$0xff]  }
  0x2f   :  { %v887_v17 = vld [vmem:[#allocation5 + $0x64] ss:$16 sps:$4 sm:$0xff]   ;;  %v889_v18 = vld [vmem:[#allocation5 + $0x6c] ss:$16 sps:$4 sm:$0xff]   ;;  %v891_v19 = vld [vmem:[#allocation5 + $0x60] ss:$16 sps:$4 sm:$0xff]  }
  0x30   :  { %283 = vmatpush1.bf16.msra.mxu0 %v873_v7  ;;  %326 = vmatpush1.bf16.msra.mxu1 %v874_v8  ;;  %v892_v20 = vld [vmem:[#allocation5 + $0x68] ss:$16 sps:$4 sm:$0xff]   ;;  %v893_v21 = vld [vmem:[#allocation5 + $0x44] ss:$16 sps:$4 sm:$0xff]   ;;  %v895_v22 = vld [vmem:[#allocation5 + $0x4c] ss:$16 sps:$4 sm:$0xff]  }
  0x31   :  { %284 = vmatprep.subr.bf16.mxu0 %v875_v9  ;;  %327 = vmatprep.subr.bf16.mxu1 %v877_v10  ;;  %v897_v23 = vld [vmem:[#allocation5 + $0x40] ss:$16 sps:$4 sm:$0xff]   ;;  %v898_v24 = vld [vmem:[#allocation5 + $0x48] ss:$16 sps:$4 sm:$0xff]   ;;  %v899_v25 = vld [vmem:[#allocation5 + $0x24] ss:$16 sps:$4 sm:$0xff]  }
  0x32   :  { %v901_v26 = vld [vmem:[#allocation5 + $0x2c] ss:$16 sps:$4 sm:$0xff]   ;;  %v903_v27 = vld [vmem:[#allocation5 + $0x20] ss:$16 sps:$4 sm:$0xff]   ;;  %v904_v28 = vld [vmem:[#allocation5 + $0x28] ss:$16 sps:$4 sm:$0xff]  }
  0x33   :  { %v905_v29 = vld [vmem:[#allocation5 + $0x4] ss:$16 sps:$4 sm:$0xff]   ;;  %v907_v30 = vld [vmem:[#allocation5 + $0xc] ss:$16 sps:$4 sm:$0xff]   ;;  %v909_v31 = vld [vmem:[#allocation5] ss:$16 sps:$4 sm:$0xff]  }
  0x34   :  { %285 = vmatpush1.bf16.msra.mxu0 %v879_v11  ;;  %328 = vmatpush1.bf16.msra.mxu1 %v880_v12  ;;  %v910_v32 = vld [vmem:[#allocation5 + $0x8] ss:$16 sps:$4 sm:$0xff]   ;;  %v63_v33 = vld [vmem:[#allocation2] sm:$0xff]  ;;  %v923_v48 = vld [vmem:[#allocation7 + $0x60] sm:$0xff]   ;;  %v101_v5 = vshrl.u32 %v100_v4, 7  ;;  %s1039_s14 = smov [#allocation8]  }
  0x35   :  { %286 = vmatprep.subr.bf16.mxu0 %v881_v13  ;;  %329 = vmatprep.subr.bf16.mxu1 %v883_v14  ;;  %v911_v35 = vld [vmem:[#allocation7 + $0x78] sm:$0xff]   ;;  %v65_v38 = vpack.c.bf16 %v64_v34, %v63_v33  ;;  %v915_v40 = vld [vmem:[#allocation7 + $0x70] sm:$0xff]   ;;  %v919_v44 = vld [vmem:[#allocation7 + $0x68] sm:$0xff]   ;;  %s730_s15 = sshll.u32 %s1039_s14, 4  ;;  %s731_s15 = int_to_ptr.vmem [resolvable:$true] %s730_s15 }
  0x36   :  { %v912_v36 = vld [vmem:[#allocation7 + $0xf8] sm:$0xff]   ;;  %v916_v41 = vld [vmem:[#allocation7 + $0xf0] sm:$0xff]   ;;  %v920_v45 = vld [vmem:[#allocation7 + $0xe8] sm:$0xff]   ;;  %v106_v6 = vsub.s32 1, %v101_v5  ;;  %v114_v7 = vsub.s32 3, %v101_v5  ;;  %v102_v8 = vsub.s32 0, %v101_v5  ;;  %p1008_p2 = scmp.lt.s32.totalorder %s731_s15, %s731_s15 }
  0x37   :  { %v913_v37 = vld [vmem:[#allocation7 + $0x38] sm:$0xff]   ;;  %v917_v42 = vld [vmem:[#allocation7 + $0x30] sm:$0xff]   ;;  %v921_v46 = vld [vmem:[#allocation7 + $0x28] sm:$0xff]   ;;  %v110_v9 = vsub.s32 2, %v101_v5 }
  0x38   :  { %287 = vmatpush1.bf16.msra.mxu0 %v885_v15  ;;  %330 = vmatpush1.bf16.msra.mxu1 %v886_v16  ;;  %v914_v39 = vld [vmem:[#allocation7 + $0xb8] sm:$0xff]   ;;  %v918_v43 = vld [vmem:[#allocation7 + $0xb0] sm:$0xff]   ;;  %v922_v47 = vld [vmem:[#allocation7 + $0xa8] sm:$0xff]  }
  0x39   :  { %288 = vmatprep.subr.bf16.mxu0 %v887_v17  ;;  %331 = vmatprep.subr.bf16.mxu1 %v889_v18  ;;  %v924_v49 = vld [vmem:[#allocation7 + $0xe0] sm:$0xff]   ;;  %v927_v52 = vld [vmem:[#allocation7 + $0x58] sm:$0xff]   ;;  %v931_v56 = vld [vmem:[#allocation7 + $0x50] sm:$0xff]  }
  0x3a   :  { %v925_v50 = vld [vmem:[#allocation7 + $0x20] sm:$0xff]   ;;  %v928_v53 = vld [vmem:[#allocation7 + $0xd8] sm:$0xff]   ;;  %v932_v57 = vld [vmem:[#allocation7 + $0xd0] sm:$0xff]  }
  0x3b   :  { %v926_v51 = vld [vmem:[#allocation7 + $0xa0] sm:$0xff]   ;;  %v929_v54 = vld [vmem:[#allocation7 + $0x18] sm:$0xff]   ;;  %v933_v58 = vld [vmem:[#allocation7 + $0x10] sm:$0xff]  }
  0x3c   :  { %289 = vmatpush1.bf16.msra.mxu0 %v891_v19  ;;  %332 = vmatpush1.bf16.msra.mxu1 %v892_v20  ;;  %v930_v55 = vld [vmem:[#allocation7 + $0x98] sm:$0xff]   ;;  %v934_v59 = vld [vmem:[#allocation7 + $0x90] sm:$0xff]   ;;  %v935_v60 = vld [vmem:[#allocation7 + $0x48] sm:$0xff]  }
  0x3d   :  { %290 = vmatprep.subr.bf16.mxu0 %v893_v21  ;;  %333 = vmatprep.subr.bf16.mxu1 %v895_v22  ;;  %v936_v61 = vld [vmem:[#allocation7 + $0xc8] sm:$0xff]   ;;  %v939_v0 = vld [vmem:[#allocation7 + $0x40] sm:$0xff]   ;;  %v98_v10 = vld [vmem:[%s1096_s2] sm:$0xf] }
  0x3e   :  { %v937_v62 = vld [vmem:[#allocation7 + $0x8] sm:$0xff]   ;;  %v940_v1 = vld [vmem:[#allocation7 + $0xc0] sm:$0xff]   ;;  %v107_v13 = vrot.slane %v98_v10, %v106_v6  ;;  %v115_v14 = vrot.slane %v98_v10, %v114_v7  ;;  %v103_v15 = vrot.slane %v98_v10, %v102_v8  ;;  %v111_v16 = vrot.slane %v98_v10, %v110_v9 }
  0x3f   :  { %v938_v63 = vld [vmem:[#allocation7 + $0x88] sm:$0xff]   ;;  %v941_v2 = vld [vmem:[#allocation7] sm:$0xff]  }
  0x40   :  { %291 = vmatpush1.bf16.msra.mxu0 %v897_v23  ;;  %334 = vmatpush1.bf16.msra.mxu1 %v898_v24  ;;  %v942_v3 = vld [vmem:[#allocation7 + $0x80] sm:$0xff]  }
  0x41   :  { %292 = vmatprep.subr.bf16.mxu0 %v899_v25  ;;  %335 = vmatprep.subr.bf16.mxu1 %v901_v26 }
  0x44   :  { %293 = vmatpush1.bf16.msra.mxu0 %v903_v27  ;;  %336 = vmatpush1.bf16.msra.mxu1 %v904_v28 }
  0x45   :  { %294 = vmatprep.subr.bf16.mxu0 %v905_v29  ;;  %337 = vmatprep.subr.bf16.mxu1 %v907_v30 }
  0x48   :  { %295 = vmatpush1.bf16.msra.mxu0 %v909_v31  ;;  %338 = vmatpush1.bf16.msra.mxu1 %v910_v32 }
  0x49   :  { %808 = vmatprep.subr.bf16.mxu0 %v911_v35  ;;  %830 = vmatprep.subr.bf16.mxu1 %v912_v36 }
  0x4b   :  { %313 = vmatmul.mubr.bf16.vlgmr.msra.gmra.mxu0 %v65_v38  ;;  %356 = vmatmul.mubr.bf16.vlgmr.msra.gmra.mxu1 %v65_v38 }
  0x4c   :  { %809 = vmatpush3.bf16.msra.mxu0 %v913_v37  ;;  %831 = vmatpush3.bf16.msra.mxu1 %v914_v39 }
  0x4d   :  { %810 = vmatprep.subr.bf16.mxu0 %v915_v40  ;;  %832 = vmatprep.subr.bf16.mxu1 %v916_v41 }
  0x50   :  { %811 = vmatpush3.bf16.msra.mxu0 %v917_v42  ;;  %833 = vmatpush3.bf16.msra.mxu1 %v918_v43 }
  0x51   :  { %812 = vmatprep.subr.bf16.mxu0 %v919_v44  ;;  %834 = vmatprep.subr.bf16.mxu1 %v920_v45  ;;  %v775_v45 = vld [vmem:[%s1098_s4] ss:$0 sm:$0xff]  ;;  %s1003_s4 = scalar_lea.vmem %s731_s15, 256 }
  0x52   :  { %p1004_p1 = scmp.ne.s32.totalorder %s731_s15, %s1003_s4  ;;  %p1009_p3 = scmp.lt.s32.totalorder %s1003_s4, %s1003_s4 }
  0x54   :  { %813 = vmatpush3.bf16.msra.mxu0 %v921_v46  ;;  %835 = vmatpush3.bf16.msra.mxu1 %v922_v47  ;;  %p1010_p4 = por %p1009_p3, %p1008_p2 }
  0x55   :  { %814 = vmatprep.subr.bf16.mxu0 %v923_v48  ;;  %836 = vmatprep.subr.bf16.mxu1 %v924_v49 }
  0x56   :  { %p1011_p5 = pnand %p1010_p4, %p1004_p1 }
  0x58   :  { %815 = vmatpush3.bf16.msra.mxu0 %v925_v50  ;;  %837 = vmatpush3.bf16.msra.mxu1 %v926_v51 }
  0x59   :  { %816 = vmatprep.subr.bf16.mxu0 %v927_v52  ;;  %838 = vmatprep.subr.bf16.mxu1 %v928_v53 }
  0x5c   :  { %817 = vmatpush3.bf16.msra.mxu0 %v929_v54  ;;  %839 = vmatpush3.bf16.msra.mxu1 %v930_v55 }
  0x5d   :  { %818 = vmatprep.subr.bf16.mxu0 %v931_v56  ;;  %840 = vmatprep.subr.bf16.mxu1 %v932_v57 }
  0x60   :  { %819 = vmatpush3.bf16.msra.mxu0 %v933_v58  ;;  %841 = vmatpush3.bf16.msra.mxu1 %v934_v59 }
  0x61   :  { %820 = vmatprep.subr.bf16.mxu0 %v935_v60  ;;  %842 = vmatprep.subr.bf16.mxu1 %v936_v61 }
  0x64   :  { %821 = vmatpush3.bf16.msra.mxu0 %v937_v62  ;;  %843 = vmatpush3.bf16.msra.mxu1 %v938_v63 }
  0x65   :  { %822 = vmatprep.subr.bf16.mxu0 %v939_v0  ;;  %844 = vmatprep.subr.bf16.mxu1 %v940_v1 }
  0x68   :  { %823 = vmatpush3.bf16.msra.mxu0 %v941_v2  ;;  %845 = vmatpush3.bf16.msra.mxu1 %v942_v3 }
 0x10b   :  { %v314_v11 = vpop.f32.mrf.mxu0  ;;  %v357_v12 = vpop.f32.mrf.mxu1 }
 0x10c   :  { %v315_v25 = vadd.f32 %v314_v11, %v103_v15  ;;  %v358_v26 = vadd.f32 %v357_v12, %v111_v16 }
 0x10d   :  { %v316_v17 = vpop.f32.mrf.mxu0  ;;  %v359_v18 = vpop.f32.mrf.mxu1 }
 0x10e   :  { %v317_v21 = vadd.f32 %v316_v17, %v107_v13  ;;  %v360_v22 = vadd.f32 %v359_v18, %v115_v14  ;;  %v366_v37 = vmax.f32 %v315_v25, 0.0  ;;  %v368_v38 = vmax.f32 %v358_v26, 0.0 }
 0x10f   :  { %v318_v19 = vpop.f32.mrf.mxu0  ;;  %v361_v20 = vpop.f32.mrf.mxu1 }
 0x110   :  { %v319_v23 = vadd.f32 %v318_v19, %v103_v15  ;;  %v362_v24 = vadd.f32 %v361_v20, %v111_v16  ;;  %v367_v33 = vmax.f32 %v317_v21, 0.0  ;;  %v369_v34 = vmax.f32 %v360_v22, 0.0 }
 0x111   :  { %v320_v27 = vpop.f32.mrf.mxu0  ;;  %v363_v28 = vpop.f32.mrf.mxu1 }
 0x112   :  { %v321_v29 = vadd.f32 %v320_v27, %v107_v13  ;;  %v364_v30 = vadd.f32 %v363_v28, %v115_v14  ;;  %v370_v31 = vmax.f32 %v319_v23, 0.0  ;;  %v372_v32 = vmax.f32 %v362_v24, 0.0 }
 0x114   :  { %v371_v35 = vmax.f32 %v321_v29, 0.0  ;;  %v373_v36 = vmax.f32 %v364_v30, 0.0  ;;  %v374_v41 = vpack.c.bf16 %v370_v31, %v366_v37  ;;  %v376_v42 = vpack.c.bf16 %v372_v32, %v368_v38 }
 0x116   :  { %v375_v39 = vpack.c.bf16 %v371_v35, %v367_v33  ;;  %v377_v40 = vpack.c.bf16 %v373_v36, %v369_v34 }
 0x118   :  { %673 = vmatprep.mubr.bf16.mxu0 %v375_v39  ;;  %714 = vmatprep.mubr.bf16.mxu1 %v377_v40 }
 0x119   :  { %674 = vmatmul.mubr.bf16.vlgmr.msra.gmra.mxu0 %v374_v41  ;;  %715 = vmatmul.mubr.bf16.vlgmr.msra.gmra.mxu1 %v376_v42 }
 0x1d9   :  { %v824_v43 = vpop.f32.mrf.mxu0  ;;  %v846_v44 = vpop.f32.mrf.mxu1 }
 0x1db   :  { %v825_v46 = vpop.f32.mrf.mxu0  ;;  %v847_v47 = vpop.f32.mrf.mxu1 }
 0x1dc   :  { %v826_v48 = vadd.f32 %v825_v46, %v824_v43  ;;  %v848_v52 = vadd.f32 %v847_v47, %v846_v44 }
 0x1dd   :  { %v827_v49 = vpop.f32.mrf.mxu0  ;;  %v849_v50 = vpop.f32.mrf.mxu1 }
 0x1de   :  { %v676_v51 = vadd.f32 %v826_v48, %v775_v45 }
 0x1df   :  { %v828_v53 = vpop.f32.mrf.mxu0  ;;  %v850_v54 = vpop.f32.mrf.mxu1 }
 0x1e0   :  { %v717_v55 = vadd.f32 %v848_v52, %v676_v51  ;;  %v829_v56 = vadd.f32 %v828_v53, %v827_v49  ;;  %v851_v58 = vadd.f32 %v850_v54, %v849_v50 }
 0x1e2   :  { %723 = vst [vmem:[#allocation8] sm:$0xff] %v717_v55  ;;  %v679_v57 = vadd.f32 %v829_v56, %v775_v45 }
 0x1e4   :  { %v720_v59 = vadd.f32 %v851_v58, %v679_v57 }
 0x1e6   :  { %724 = vst [vmem:[#allocation8 + $0x8] sm:$0xff] %v720_v59 }
 0x1e7   :  { %1014 = shalt.err (!%p1011_p5)
}
 0x1e8   :  { %736 = dma.vmem_to_hbm [thread:$0]  %s731_s15, 256, %s1099_s5, [#allocation4], %s1033_s28, %s1033_s28, %s1034_s29  }
 0x1e9   :  { %1027 = dma.done.wait [#allocation4], 256  }
 0x1ea   :  { %1028 = vsyncadd [#allocation4], 4294967040 }
 0x1eb   :  { %740 = vsyncpa [#allocation3], 1 }
 0x1ec   :  { %741 = vsyncpa [#allocation6], 1 }
 0x1ed   :  { %742 = vsyncpa [#allocation4], 1 }

</bundles_post_ra>
